<compile_context>
chip_gen: v6e
topology: v6e:2x2x1
jax: 0.10.0
libtpu: 0.0.40
codegen_flags: <defaults>
</compile_context>

<pallas_src>
from functools import partial

import numpy as np
import jax
import jax.numpy as jnp
from jax.experimental import pallas as pl
from jax.experimental.pallas import tpu as pltpu

_LANE = 128
_TARGET_BLOCK_BYTES = 2 * 1024 * 1024  # ~2 MiB per block; 4x when double-buffered in+out


# ------------------------------ Pallas kernel -------------------------------
def _activation_kernel(x_ref, o_ref, *, act_func):
    x = x_ref[...].astype(jnp.float32)
    if act_func == "relu":
        y = jnp.maximum(x, 0.0)
    elif act_func == "relu6":
        y = jnp.minimum(jnp.maximum(x, 0.0), 6.0)
    elif act_func == "sigmoid":
        # Exact sigmoid; exp goes to the EUP, everything is hidden under DMA.
        y = 1.0 / (1.0 + jnp.exp(-x))
    elif act_func in ("hsigmoid", "hard_sigmoid"):
        # MyHSigmoid: relu6(x + 3.0) * 0.16666667  (constant matches the PyTorch module)
        y = jnp.minimum(jnp.maximum(x + 3.0, 0.0), 6.0) * 0.16666667
    elif act_func in ("hswish", "hard_swish"):
        # nn.Hardswish: x * relu6(x + 3) / 6   (multiply by reciprocal constant)
        y = x * (jnp.minimum(jnp.maximum(x + 3.0, 0.0), 6.0) * (1.0 / 6.0))
    else:
        raise NotImplementedError(act_func)
    o_ref[...] = y.astype(o_ref.dtype)


# --------------------------------- wrapper -----------------------------------
def _choose_width(n, sub_mult):
    """Largest lane width (multiple of 128) dividing n, preferring >= sub_mult rows."""
    best = None
    for w in (2048, 1024, 512, 256, 128):
        if n % w == 0:
            if best is None:
                best = w
            if n // w >= sub_mult:
                return w, 0
    if best is not None:
        return best, 0
    return None, 0


def activation_pallas(x, act_func):
    """Applies Activation(act_func) elementwise to an arbitrary-shape array."""
    orig_shape, dtype = x.shape, x.dtype
    n = int(np.prod(orig_shape))
    elt = jnp.dtype(dtype).itemsize
    # f32 -> 8-row tiles; bf16 -> 16; int8/fp8 -> 32 (packed sublane minimum).
    sub_mult = max(8, 32 // elt)

    W, _ = _choose_width(n, sub_mult)
    if W is None:
        # Rare fallback (n not a multiple of 128): minimal pad + final slice.
        # TODO(synk): the pad/slice cost one extra HBM round trip in this case.
        W = _LANE
        R = pl.cdiv(n, W)
        pad = R * W - n
    else:
        R = n // W
        pad = 0

    xf = jnp.ravel(x)
    if pad:
        xf = jnp.pad(xf, (0, pad))
    x2 = xf.reshape(R, W)  # free bitcast when pad == 0

    # Rows per block: target ~2 MiB, rounded to the sublane multiple; cap at
    # ~half the rows for medium/large inputs so v7x's two TCs both get work.
    row_bytes = W * elt
    target_rows = max(sub_mult, (_TARGET_BLOCK_BYTES // row_bytes) // sub_mult * sub_mult)
    if R >= 2 * sub_mult:
        half_rows = pl.cdiv(pl.cdiv(R, 2), sub_mult) * sub_mult
        target_rows = min(target_rows, half_rows)

    if target_rows >= R:
        block_r = R              # single full-extent block along rows (always legal)
    else:
        block_r = target_rows    # multiple of sub_mult; ragged last block runs OOB
    grid_r = pl.cdiv(R, block_r)

    out = pl.pallas_call(
        partial(_activation_kernel, act_func=act_func),
        out_shape=jax.ShapeDtypeStruct((R, W), dtype),
        grid=(grid_r,),
        in_specs=[pl.BlockSpec((block_r, W), lambda i: (i, 0))],
        out_specs=pl.BlockSpec((block_r, W), lambda i: (i, 0)),
        compiler_params=pltpu.CompilerParams(
            dimension_semantics=("parallel",)),   # v7x: shard row blocks across TCs
    )(x2)

    out_flat = out.reshape(-1)
    if pad:
        out_flat = out_flat[:n]
    return out_flat.reshape(orig_shape)


# ----------------------------- pure-JAX reference ----------------------------
def _reference(x, act_func):
    if act_func == "relu":
        return jnp.maximum(x, 0.0)
    if act_func == "relu6":
        return jnp.clip(x, 0.0, 6.0)
    if act_func == "sigmoid":
        return jax.nn.sigmoid(x)
    if act_func in ("hsigmoid", "hard_sigmoid"):
        return jnp.clip(x + 3.0, 0.0, 6.0) * 0.16666667
    if act_func in ("hswish", "hard_swish"):
        return x * jnp.clip(x + 3.0, 0.0, 6.0) / 6.0
    raise NotImplementedError(act_func)


# ------------------------------------ main -----------------------------------
if __name__ == "__main__":
    key = jax.random.PRNGKey(0)
    # Scale so the clip regions of relu6 / hsigmoid / hswish are exercised.
    x = 6.0 * jax.random.normal(key, (2, 4, 16, 16), jnp.float32)

    for act_func in ("relu", "relu6", "sigmoid", "hsigmoid", "hswish"):
        out = jax.block_until_ready(activation_pallas(x, act_func))
        ref = jax.block_until_ready(_reference(x, act_func))
        out_np, ref_np = np.asarray(out), np.asarray(ref)
        if not np.allclose(out_np, ref_np, atol=1e-5, rtol=1e-5):
            raise AssertionError(
                f"{act_func}: mismatch vs reference, "
                f"max abs diff = {np.max(np.abs(out_np - ref_np))}")

    print("KERNEL_OK")
</pallas_src>

<mosaic_0001>
module attributes {stable_mosaic.version = 11 : i64} {
  func.func @_activation_kernel(%arg0: i32, %arg1: memref<8x256xf32, #tpu.memory_space<vmem>>, %arg2: memref<8x256xf32, #tpu.memory_space<vmem>>) attributes {dimension_semantics = [#tpu.dimension_semantics<parallel>], iteration_bounds = array<i64: 1>, scalar_prefetch = 0 : i64, scratch_operands = 0 : i64, tpu.core_type = #tpu.core_type<tc>, window_params = [{transform_indices = @transform_0, window_bounds = array<i64: 8, 256>}, {transform_indices = @transform_1, window_bounds = array<i64: 8, 256>}]} {
    %c0 = arith.constant 0 : index
    %c0_0 = arith.constant 0 : index
    %0 = vector.load %arg1[%c0, %c0_0] : memref<8x256xf32, #tpu.memory_space<vmem>>, vector<8x256xf32>
    %cst = arith.constant 0.000000e+00 : f32
    %1 = vector.broadcast %cst : f32 to vector<8x256xf32>
    %2 = arith.maximumf %0, %1 : vector<8x256xf32>
    %c0_1 = arith.constant 0 : index
    %c0_2 = arith.constant 0 : index
    %3 = vector.load %arg2[%c0_1, %c0_2] : memref<8x256xf32, #tpu.memory_space<vmem>>, vector<8x256xf32>
    tpu.vector_store %arg2[%c0_1, %c0_2], %2 {strides = array<i32>} : memref<8x256xf32, #tpu.memory_space<vmem>>, vector<8x256xf32>,
    return
  }
  func.func @transform_0(%arg0: i32) -> (i32, i32) {
    %c0_i32 = arith.constant 0 : i32
    %c0_i32_0 = arith.constant 0 : i32
    return %arg0, %c0_i32 : i32, i32
  }
  func.func @transform_1(%arg0: i32) -> (i32, i32) {
    %c0_i32 = arith.constant 0 : i32
    %c0_i32_0 = arith.constant 0 : i32
    return %arg0, %c0_i32 : i32, i32
  }
}

</mosaic_0001>

<bundles_post_ra>
// kernel: tpu_custom_call.1
= control target key start
LH: loop header
LB: loop body
LE: loop exit
PB: predicated region body
PF: predicated region fallthrough
CT: control target
= control target key end

     0   :  { %6 = vsyncpa [#allocation3], 0  ;;  %s106_s0 = inlined_call_operand.hbm [shape: f32[8,256], index: 0, kind: input, shape index: {}]   ;;  %s107_s1 = inlined_call_operand.hbm [shape: f32[8,256], index: 1, kind: output, shape index: {}]  }
   0x1   :  { %7 = vsyncpa [#allocation4], 0  ;;  %s88_s6 = smov [#allocation2]  }
   0x2   :  { %s14_s7 = sshll.u32 %s88_s6, 4  ;;  %s15_s7 = int_to_ptr.vmem [resolvable:$true] %s14_s7 }
   0x3   :  { %s52_s8 = scalar_lea.vmem %s15_s7, 256  ;;  %p57_p1 = scmp.lt.s32.totalorder %s15_s7, %s15_s7 }
   0x4   :  { %p53_p0 = scmp.ne.s32.totalorder %s15_s7, %s52_s8  ;;  %p58_p2 = scmp.lt.s32.totalorder %s52_s8, %s52_s8 }
   0x6   :  { %p59_p3 = por %p58_p2, %p57_p1 }
   0x8   :  { %p60_p4 = pnand %p59_p3, %p53_p0 }
   0xa   :  { %63 = shalt.err (!%p60_p4)
}
   0xb   :  { %17 = dma.hbm_to_vmem [thread:$0]  %s106_s0, 256, %s15_s7, [#allocation3]  }
   0xc   :  { %84 = dma.done.wait [#allocation3], 256  }
   0xd   :  { %85 = vsyncadd [#allocation3], 4294967040  ;;  %s89_s11 = smov [#allocation5]   ;;  %v21_v0 = vld [vmem:[#allocation2] sm:$0xff]  ;;  %v22_v1 = vld [vmem:[#allocation2 + $0x8] sm:$0xff] }
   0xe   :  { %s33_s12 = sshll.u32 %s89_s11, 4  ;;  %v23_v2 = vmax.f32 %v21_v0, 0.0  ;;  %v24_v3 = vmax.f32 %v22_v1, 0.0  ;;  %s34_s12 = int_to_ptr.vmem [resolvable:$true] %s33_s12 }
   0xf   :  { %s64_s13 = scalar_lea.vmem %s34_s12, 256  ;;  %p69_p6 = scmp.lt.s32.totalorder %s34_s12, %s34_s12 }
  0x10   :  { %25 = vst [vmem:[#allocation5] sm:$0xff] %v23_v2  ;;  %26 = vst [vmem:[#allocation5 + $0x8] sm:$0xff] %v24_v3  ;;  %p65_p5 = scmp.ne.s32.totalorder %s34_s12, %s64_s13  ;;  %p70_p7 = scmp.lt.s32.totalorder %s64_s13, %s64_s13 }
  0x12   :  { %p71_p8 = por %p70_p7, %p69_p6 }
  0x14   :  { %p72_p9 = pnand %p71_p8, %p65_p5 }
  0x16   :  { %75 = shalt.err (!%p72_p9)
}
  0x17   :  { %36 = dma.vmem_to_hbm [thread:$0]  %s34_s12, 256, %s107_s1, [#allocation4]  }
  0x18   :  { %86 = dma.done.wait [#allocation4], 256  }
  0x19   :  { %87 = vsyncadd [#allocation4], 4294967040 }
  0x1a   :  { %40 = vsyncpa [#allocation3], 1 }
  0x1b   :  { %41 = vsyncpa [#allocation4], 1 }

</bundles_post_ra>
